<compile_context>
chip_gen: v5e
topology: v5e:2x2
jax: 0.10.0
libtpu: 0.0.40
codegen_flags: <defaults>
</compile_context>

<pallas_src>
import functools

import jax
import jax.numpy as jnp
from jax.experimental import pallas as pl
from jax.experimental.pallas import tpu as pltpu


def _mlp_kernel(x_ref, w1_ref, b1_ref, w2_ref, b2_ref, w3_ref, b3_ref,
                gamma_ref, beta_ref, o_ref, *, eps):
    # --- three Linear layers: bf16 operands on the MXU, f32 accumulation ---
    xb = x_ref[...].astype(jnp.bfloat16)
    h1 = jnp.dot(xb, w1_ref[...], preferred_element_type=jnp.float32) + b1_ref[...]
    h1 = jnp.maximum(h1, 0.0)

    h2 = jnp.dot(h1.astype(jnp.bfloat16), w2_ref[...],
                 preferred_element_type=jnp.float32) + b2_ref[...]
    h2 = jnp.maximum(h2, 0.0)

    y = jnp.dot(h2.astype(jnp.bfloat16), w3_ref[...],
                preferred_element_type=jnp.float32) + b3_ref[...]

    # --- LayerNorm (f32), single pass: var = E[y^2] - mean^2 ---
    inv_n = 1.0 / y.shape[-1]
    s1 = jnp.sum(y, axis=-1, keepdims=True)
    s2 = jnp.sum(y * y, axis=-1, keepdims=True)
    mean = s1 * inv_n
    var = jnp.maximum(s2 * inv_n - mean * mean, 0.0)
    y_norm = (y - mean) * jax.lax.rsqrt(var + eps)
    out = y_norm * gamma_ref[...] + beta_ref[...]

    o_ref[...] = out.astype(o_ref.dtype)


def _round_up(n, m):
    return -(-n // m) * m


def _pick_block_b(batch, target=512):
    """Batch tile: large enough to fill the MXU M-dim, >=2 grid steps when the batch
    allows (keeps both v7x TensorCores busy), rounded to the 8-sublane grain."""
    steps = max(1, pl.cdiv(batch, target))
    if batch >= 512 and steps < 2:
        steps = 2
    return _round_up(pl.cdiv(batch, steps), 8)


def mlp_forward(x, params, *, block_b=None, eps=1e-5, out_dtype=None):
    """Fused MLP forward. x: [B, input_size]."""
    w1, b1, w2, b2, w3, b3, gamma, beta = params
    B, in_dim = x.shape
    hid = w1.shape[1]
    out_dim = w3.shape[1]
    out_dtype = x.dtype if out_dtype is None else out_dtype

    bb = _pick_block_b(B) if block_b is None else _round_up(block_b, 8)
    grid = pl.cdiv(B, bb)
    b_pad = grid * bb
    x_in = jnp.pad(x, ((0, b_pad - B), (0, 0))) if b_pad != B else x

    # Weights in bf16 (MXU-native, half the DMA bytes); biases / affine params in f32,
    # reshaped to (1, dim) so they are proper 2D VMEM tiles.
    w1b, w2b, w3b = (w.astype(jnp.bfloat16) for w in (w1, w2, w3))
    b1_2d = b1.reshape(1, -1).astype(jnp.float32)
    b2_2d = b2.reshape(1, -1).astype(jnp.float32)
    b3_2d = b3.reshape(1, -1).astype(jnp.float32)
    gamma_2d = gamma.reshape(1, -1).astype(jnp.float32)
    beta_2d = beta.reshape(1, -1).astype(jnp.float32)
    residents = (w1b, b1_2d, w2b, b2_2d, w3b, b3_2d, gamma_2d, beta_2d)
    resident_bytes = sum(int(a.size) * a.dtype.itemsize for a in residents)

    # Advisory cost estimate so XLA schedules neighbours sensibly around the call.
    out_bytes = jnp.dtype(out_dtype).itemsize
    cost = pl.CostEstimate(
        flops=int(2 * b_pad * (in_dim * hid + hid * hid + hid * out_dim)
                  + 10 * b_pad * out_dim),
        transcendentals=int(b_pad),  # one rsqrt per row
        bytes_accessed=int(x_in.size * x_in.dtype.itemsize
                           + b_pad * out_dim * out_bytes + resident_bytes),
    )

    # Only raise the scoped-VMEM limit if the chosen tile actually needs it
    # (v5e default is 16 MiB; v6e/v7x 32 MiB; v7x physical is 64 MiB).
    vmem_est = (2 * bb * in_dim * x_in.dtype.itemsize      # x, double-buffered
                + 2 * bb * out_dim * out_bytes             # out, double-buffered
                + resident_bytes                           # resident weights
                + 4 * bb * max(hid, out_dim) * 4)          # live f32 intermediates
    vmem_limit = None
    if vmem_est > 12 * 1024 * 1024:
        vmem_limit = min(int(vmem_est * 1.5), 64 * 1024 * 1024)

    kernel = functools.partial(_mlp_kernel, eps=eps)
    x_spec = pl.BlockSpec((bb, in_dim), lambda i: (i, 0))
    o_spec = pl.BlockSpec((bb, out_dim), lambda i: (i, 0))

    def run(single_buffer_weights):
        if single_buffer_weights:
            # Constant index_map -> single buffer is enough; saves VMEM + DMA descriptors.
            def resident(shape):
                return pl.BlockSpec(shape, lambda i: (0, 0),
                                    pipeline_mode=pl.Buffered(1))
        else:
            def resident(shape):
                return pl.BlockSpec(shape, lambda i: (0, 0))

        return pl.pallas_call(
            kernel,
            out_shape=jax.ShapeDtypeStruct((b_pad, out_dim), out_dtype),
            grid_spec=pltpu.PrefetchScalarGridSpec(
                num_scalar_prefetch=0,
                grid=(grid,),
                in_specs=[x_spec] + [resident(a.shape) for a in residents],
                out_specs=o_spec,
            ),
            compiler_params=pltpu.CompilerParams(
                dimension_semantics=("parallel",),
                vmem_limit_bytes=vmem_limit),
            cost_estimate=cost,
        )(x_in, *residents)

    try:
        out = run(single_buffer_weights=True)
    except Exception:
        # Fallback for environments where per-BlockSpec pipeline_mode isn't supported.
        out = run(single_buffer_weights=False)

    return out[:B] if b_pad != B else out


def init_mlp_params(key, input_size, hidden_size=128, output_size=128):
    """Deterministic init mirroring PyTorch nn.Linear defaults (U(-1/sqrt(fan_in), +))."""
    def linear(key, fan_in, fan_out):
        kw, kb = jax.random.split(key)
        bound = 1.0 / jnp.sqrt(fan_in)
        # stored as [in, out] (i.e. W.T relative to PyTorch layout)
        w = jax.random.uniform(kw, (fan_in, fan_out), jnp.float32, -bound, bound)
        b = jax.random.uniform(kb, (fan_out,), jnp.float32, -bound, bound)
        return w, b

    k1, k2, k3 = jax.random.split(key, 3)
    w1, b1 = linear(k1, input_size, hidden_size)
    w2, b2 = linear(k2, hidden_size, hidden_size)
    w3, b3 = linear(k3, hidden_size, output_size)
    gamma = jnp.ones((output_size,), jnp.float32)   # LayerNorm weight
    beta = jnp.zeros((output_size,), jnp.float32)   # LayerNorm bias
    return (w1, b1, w2, b2, w3, b3, gamma, beta)


def mlp_reference(x, params, eps=1e-5, bf16_matmul=True):
    """Plain-JAX reference (mirrors the kernel's bf16-operand / f32-accumulate matmuls)."""
    w1, b1, w2, b2, w3, b3, gamma, beta = params
    md = jnp.bfloat16 if bf16_matmul else x.dtype
    h = jnp.maximum(jnp.dot(x.astype(md), w1.astype(md),
                            preferred_element_type=jnp.float32) + b1, 0.0)
    h = jnp.maximum(jnp.dot(h.astype(md), w2.astype(md),
                            preferred_element_type=jnp.float32) + b2, 0.0)
    y = jnp.dot(h.astype(md), w3.astype(md),
                preferred_element_type=jnp.float32) + b3
    mean = jnp.mean(y, axis=-1, keepdims=True)
    var = jnp.mean(jnp.square(y - mean), axis=-1, keepdims=True)
    return (y - mean) * jax.lax.rsqrt(var + eps) * gamma + beta


if __name__ == "__main__":
    key = jax.random.PRNGKey(0)
    k_param, k_x, k_x2 = jax.random.split(key, 3)

    batch, input_size = 8, 32          # MLP(input_size=32), defaults: hidden=128, out=128
    params = init_mlp_params(k_param, input_size)

    x = jax.random.normal(k_x, (batch, input_size), jnp.float32)
    out = jax.block_until_ready(mlp_forward(x, params))
    ref = mlp_reference(x, params)
    assert out.shape == (batch, 128)
    assert jnp.allclose(out, ref, atol=5e-3, rtol=5e-3), "mismatch vs reference"

    # Ragged batch exercises the padded last-tile path.
    x2 = jax.random.normal(k_x2, (10, input_size), jnp.float32)
    out2 = jax.block_until_ready(mlp_forward(x2, params))
    ref2 = mlp_reference(x2, params)
    assert out2.shape == (10, 128)
    assert jnp.allclose(out2, ref2, atol=5e-3, rtol=5e-3), "mismatch vs reference (ragged)"

    print("KERNEL_OK")
</pallas_src>

<mosaic_0001>
module attributes {stable_mosaic.version = 11 : i64} {
  func.func @_mlp_kernel(%arg0: i32, %arg1: memref<8x32xf32, #tpu.memory_space<vmem>>, %arg2: memref<32x128xbf16, #tpu.memory_space<vmem>>, %arg3: memref<1x128xf32, #tpu.memory_space<vmem>>, %arg4: memref<128x128xbf16, #tpu.memory_space<vmem>>, %arg5: memref<1x128xf32, #tpu.memory_space<vmem>>, %arg6: memref<128x128xbf16, #tpu.memory_space<vmem>>, %arg7: memref<1x128xf32, #tpu.memory_space<vmem>>, %arg8: memref<1x128xf32, #tpu.memory_space<vmem>>, %arg9: memref<1x128xf32, #tpu.memory_space<vmem>>, %arg10: memref<8x128xf32, #tpu.memory_space<vmem>>) attributes {dimension_semantics = [#tpu.dimension_semantics<parallel>], iteration_bounds = array<i64: 1>, scalar_prefetch = 0 : i64, scratch_operands = 0 : i64, tpu.core_type = #tpu.core_type<tc>, window_params = [{transform_indices = @transform_0, window_bounds = array<i64: 8, 32>}, {pipeline_mode = #tpu.pipeline_mode<synchronous>, transform_indices = @transform_1, window_bounds = array<i64: 32, 128>}, {pipeline_mode = #tpu.pipeline_mode<synchronous>, transform_indices = @transform_2, window_bounds = array<i64: 1, 128>}, {pipeline_mode = #tpu.pipeline_mode<synchronous>, transform_indices = @transform_3, window_bounds = array<i64: 128, 128>}, {pipeline_mode = #tpu.pipeline_mode<synchronous>, transform_indices = @transform_4, window_bounds = array<i64: 1, 128>}, {pipeline_mode = #tpu.pipeline_mode<synchronous>, transform_indices = @transform_5, window_bounds = array<i64: 128, 128>}, {pipeline_mode = #tpu.pipeline_mode<synchronous>, transform_indices = @transform_6, window_bounds = array<i64: 1, 128>}, {pipeline_mode = #tpu.pipeline_mode<synchronous>, transform_indices = @transform_7, window_bounds = array<i64: 1, 128>}, {pipeline_mode = #tpu.pipeline_mode<synchronous>, transform_indices = @transform_8, window_bounds = array<i64: 1, 128>}, {transform_indices = @transform_9, window_bounds = array<i64: 8, 128>}]} {
    %c0 = arith.constant 0 : index
    %c0_0 = arith.constant 0 : index
    %0 = vector.load %arg1[%c0, %c0_0] : memref<8x32xf32, #tpu.memory_space<vmem>>, vector<8x32xf32>
    %1 = arith.truncf %0 : vector<8x32xf32> to vector<8x32xbf16>
    %c0_1 = arith.constant 0 : index
    %c0_2 = arith.constant 0 : index
    %2 = vector.load %arg2[%c0_1, %c0_2] : memref<32x128xbf16, #tpu.memory_space<vmem>>, vector<32x128xbf16>
    %cst = arith.constant dense<0.000000e+00> : vector<8x128xf32>
    %3 = tpu.matmul %1, %2, %cst {dimension_numbers = #tpu.dot_dimension_numbers<[1], [0], [0], [1], [0, 0, 1, 1], [], []>} : vector<8x32xbf16>, vector<32x128xbf16>, vector<8x128xf32> -> vector<8x128xf32>
    %c0_3 = arith.constant 0 : index
    %c0_4 = arith.constant 0 : index
    %4 = vector.load %arg3[%c0_3, %c0_4] : memref<1x128xf32, #tpu.memory_space<vmem>>, vector<1x128xf32>
    %5 = vector.broadcast %4 : vector<1x128xf32> to vector<8x128xf32>
    %6 = arith.addf %3, %5 : vector<8x128xf32>
    %cst_5 = arith.constant 0.000000e+00 : f32
    %7 = vector.broadcast %cst_5 : f32 to vector<8x128xf32>
    %8 = arith.maximumf %6, %7 : vector<8x128xf32>
    %9 = arith.truncf %8 : vector<8x128xf32> to vector<8x128xbf16>
    %c0_6 = arith.constant 0 : index
    %c0_7 = arith.constant 0 : index
    %10 = vector.load %arg4[%c0_6, %c0_7] : memref<128x128xbf16, #tpu.memory_space<vmem>>, vector<128x128xbf16>
    %cst_8 = arith.constant dense<0.000000e+00> : vector<8x128xf32>
    %11 = tpu.matmul %9, %10, %cst_8 {dimension_numbers = #tpu.dot_dimension_numbers<[1], [0], [0], [1], [0, 0, 1, 1], [], []>} : vector<8x128xbf16>, vector<128x128xbf16>, vector<8x128xf32> -> vector<8x128xf32>
    %c0_9 = arith.constant 0 : index
    %c0_10 = arith.constant 0 : index
    %12 = vector.load %arg5[%c0_9, %c0_10] : memref<1x128xf32, #tpu.memory_space<vmem>>, vector<1x128xf32>
    %13 = vector.broadcast %12 : vector<1x128xf32> to vector<8x128xf32>
    %14 = arith.addf %11, %13 : vector<8x128xf32>
    %cst_11 = arith.constant 0.000000e+00 : f32
    %15 = vector.broadcast %cst_11 : f32 to vector<8x128xf32>
    %16 = arith.maximumf %14, %15 : vector<8x128xf32>
    %17 = arith.truncf %16 : vector<8x128xf32> to vector<8x128xbf16>
    %c0_12 = arith.constant 0 : index
    %c0_13 = arith.constant 0 : index
    %18 = vector.load %arg6[%c0_12, %c0_13] : memref<128x128xbf16, #tpu.memory_space<vmem>>, vector<128x128xbf16>
    %cst_14 = arith.constant dense<0.000000e+00> : vector<8x128xf32>
    %19 = tpu.matmul %17, %18, %cst_14 {dimension_numbers = #tpu.dot_dimension_numbers<[1], [0], [0], [1], [0, 0, 1, 1], [], []>} : vector<8x128xbf16>, vector<128x128xbf16>, vector<8x128xf32> -> vector<8x128xf32>
    %c0_15 = arith.constant 0 : index
    %c0_16 = arith.constant 0 : index
    %20 = vector.load %arg7[%c0_15, %c0_16] : memref<1x128xf32, #tpu.memory_space<vmem>>, vector<1x128xf32>
    %21 = vector.broadcast %20 : vector<1x128xf32> to vector<8x128xf32>
    %22 = arith.addf %19, %21 : vector<8x128xf32>
    %cst_17 = arith.constant dense<0.000000e+00> : vector<8xf32>
    %23 = vector.multi_reduction <add>, %22, %cst_17 [1] : vector<8x128xf32> to vector<8xf32>
    %24 = vector.shape_cast %23 : vector<8xf32> to vector<8x1xf32>
    %25 = arith.mulf %22, %22 : vector<8x128xf32>
    %cst_18 = arith.constant dense<0.000000e+00> : vector<8xf32>
    %26 = vector.multi_reduction <add>, %25, %cst_18 [1] : vector<8x128xf32> to vector<8xf32>
    %27 = vector.shape_cast %26 : vector<8xf32> to vector<8x1xf32>
    %cst_19 = arith.constant 7.812500e-03 : f32
    %28 = vector.broadcast %cst_19 : f32 to vector<8x1xf32>
    %29 = arith.mulf %24, %28 : vector<8x1xf32>
    %cst_20 = arith.constant 7.812500e-03 : f32
    %30 = vector.broadcast %cst_20 : f32 to vector<8x1xf32>
    %31 = arith.mulf %27, %30 : vector<8x1xf32>
    %32 = arith.mulf %29, %29 : vector<8x1xf32>
    %33 = arith.subf %31, %32 : vector<8x1xf32>
    %cst_21 = arith.constant 0.000000e+00 : f32
    %34 = vector.broadcast %cst_21 : f32 to vector<8x1xf32>
    %35 = arith.maximumf %33, %34 : vector<8x1xf32>
    %36 = vector.broadcast %29 : vector<8x1xf32> to vector<8x128xf32>
    %37 = arith.subf %22, %36 : vector<8x128xf32>
    %cst_22 = arith.constant 9.99999974E-6 : f32
    %38 = vector.broadcast %cst_22 : f32 to vector<8x1xf32>
    %39 = arith.addf %35, %38 : vector<8x1xf32>
    %40 = math.rsqrt %39 : vector<8x1xf32>
    %41 = vector.broadcast %40 : vector<8x1xf32> to vector<8x128xf32>
    %42 = arith.mulf %37, %41 : vector<8x128xf32>
    %c0_23 = arith.constant 0 : index
    %c0_24 = arith.constant 0 : index
    %43 = vector.load %arg8[%c0_23, %c0_24] : memref<1x128xf32, #tpu.memory_space<vmem>>, vector<1x128xf32>
    %44 = vector.broadcast %43 : vector<1x128xf32> to vector<8x128xf32>
    %45 = arith.mulf %42, %44 : vector<8x128xf32>
    %c0_25 = arith.constant 0 : index
    %c0_26 = arith.constant 0 : index
    %46 = vector.load %arg9[%c0_25, %c0_26] : memref<1x128xf32, #tpu.memory_space<vmem>>, vector<1x128xf32>
    %47 = vector.broadcast %46 : vector<1x128xf32> to vector<8x128xf32>
    %48 = arith.addf %45, %47 : vector<8x128xf32>
    %c0_27 = arith.constant 0 : index
    %c0_28 = arith.constant 0 : index
    %49 = vector.load %arg10[%c0_27, %c0_28] : memref<8x128xf32, #tpu.memory_space<vmem>>, vector<8x128xf32>
    tpu.vector_store %arg10[%c0_27, %c0_28], %48 {strides = array<i32>} : memref<8x128xf32, #tpu.memory_space<vmem>>, vector<8x128xf32>,
    return
  }
  func.func @transform_0(%arg0: i32) -> (i32, i32) {
    %c0_i32 = arith.constant 0 : i32
    %c0_i32_0 = arith.constant 0 : i32
    return %arg0, %c0_i32 : i32, i32
  }
  func.func @transform_1(%arg0: i32) -> (i32, i32) {
    %c0_i32 = arith.constant 0 : i32
    %c0_i32_0 = arith.constant 0 : i32
    %c0_i32_1 = arith.constant 0 : i32
    return %c0_i32, %c0_i32_0 : i32, i32
  }
  func.func @transform_2(%arg0: i32) -> (i32, i32) {
    %c0_i32 = arith.constant 0 : i32
    %c0_i32_0 = arith.constant 0 : i32
    %c0_i32_1 = arith.constant 0 : i32
    return %c0_i32, %c0_i32_0 : i32, i32
  }
  func.func @transform_3(%arg0: i32) -> (i32, i32) {
    %c0_i32 = arith.constant 0 : i32
    %c0_i32_0 = arith.constant 0 : i32
    %c0_i32_1 = arith.constant 0 : i32
    return %c0_i32, %c0_i32_0 : i32, i32
  }
  func.func @transform_4(%arg0: i32) -> (i32, i32) {
    %c0_i32 = arith.constant 0 : i32
    %c0_i32_0 = arith.constant 0 : i32
    %c0_i32_1 = arith.constant 0 : i32
    return %c0_i32, %c0_i32_0 : i32, i32
  }
  func.func @transform_5(%arg0: i32) -> (i32, i32) {
    %c0_i32 = arith.constant 0 : i32
    %c0_i32_0 = arith.constant 0 : i32
    %c0_i32_1 = arith.constant 0 : i32
    return %c0_i32, %c0_i32_0 : i32, i32
  }
  func.func @transform_6(%arg0: i32) -> (i32, i32) {
    %c0_i32 = arith.constant 0 : i32
    %c0_i32_0 = arith.constant 0 : i32
    %c0_i32_1 = arith.constant 0 : i32
    return %c0_i32, %c0_i32_0 : i32, i32
  }
  func.func @transform_7(%arg0: i32) -> (i32, i32) {
    %c0_i32 = arith.constant 0 : i32
    %c0_i32_0 = arith.constant 0 : i32
    %c0_i32_1 = arith.constant 0 : i32
    return %c0_i32, %c0_i32_0 : i32, i32
  }
  func.func @transform_8(%arg0: i32) -> (i32, i32) {
    %c0_i32 = arith.constant 0 : i32
    %c0_i32_0 = arith.constant 0 : i32
    %c0_i32_1 = arith.constant 0 : i32
    return %c0_i32, %c0_i32_0 : i32, i32
  }
  func.func @transform_9(%arg0: i32) -> (i32, i32) {
    %c0_i32 = arith.constant 0 : i32
    %c0_i32_0 = arith.constant 0 : i32
    return %arg0, %c0_i32 : i32, i32
  }
}

module attributes {stable_mosaic.version = 11 : i64} {
  func.func @_mlp_kernel(%arg0: i32, %arg1: memref<8x32xf32, #tpu.memory_space<vmem>>, %arg2: memref<32x128xbf16, #tpu.memory_space<vmem>>, %arg3: memref<1x128xf32, #tpu.memory_space<vmem>>, %arg4: memref<128x128xbf16, #tpu.memory_space<vmem>>, %arg5: memref<1x128xf32, #tpu.memory_space<vmem>>, %arg6: memref<128x128xbf16, #tpu.memory_space<vmem>>, %arg7: memref<1x128xf32, #tpu.memory_space<vmem>>, %arg8: memref<1x128xf32, #tpu.memory_space<vmem>>, %arg9: memref<1x128xf32, #tpu.memory_space<vmem>>, %arg10: memref<8x128xf32, #tpu.memory_space<vmem>>) attributes {dimension_semantics = [#tpu.dimension_semantics<parallel>], iteration_bounds = array<i64: 1>, scalar_prefetch = 0 : i64, scratch_operands = 0 : i64, tpu.core_type = #tpu.core_type<tc>, window_params = [{transform_indices = @transform_0, window_bounds = array<i64: 8, 32>}, {pipeline_mode = #tpu.pipeline_mode<synchronous>, transform_indices = @transform_1, window_bounds = array<i64: 32, 128>}, {pipeline_mode = #tpu.pipeline_mode<synchronous>, transform_indices = @transform_2, window_bounds = array<i64: 1, 128>}, {pipeline_mode = #tpu.pipeline_mode<synchronous>, transform_indices = @transform_3, window_bounds = array<i64: 128, 128>}, {pipeline_mode = #tpu.pipeline_mode<synchronous>, transform_indices = @transform_4, window_bounds = array<i64: 1, 128>}, {pipeline_mode = #tpu.pipeline_mode<synchronous>, transform_indices = @transform_5, window_bounds = array<i64: 128, 128>}, {pipeline_mode = #tpu.pipeline_mode<synchronous>, transform_indices = @transform_6, window_bounds = array<i64: 1, 128>}, {pipeline_mode = #tpu.pipeline_mode<synchronous>, transform_indices = @transform_7, window_bounds = array<i64: 1, 128>}, {pipeline_mode = #tpu.pipeline_mode<synchronous>, transform_indices = @transform_8, window_bounds = array<i64: 1, 128>}, {transform_indices = @transform_9, window_bounds = array<i64: 8, 128>}]} {
    %c0 = arith.constant 0 : index
    %c0_0 = arith.constant 0 : index
    %0 = vector.load %arg1[%c0, %c0_0] : memref<8x32xf32, #tpu.memory_space<vmem>>, vector<8x32xf32>
    %1 = arith.truncf %0 : vector<8x32xf32> to vector<8x32xbf16>
    %c0_1 = arith.constant 0 : index
    %c0_2 = arith.constant 0 : index
    %2 = vector.load %arg2[%c0_1, %c0_2] : memref<32x128xbf16, #tpu.memory_space<vmem>>, vector<32x128xbf16>
    %cst = arith.constant dense<0.000000e+00> : vector<8x128xf32>
    %3 = tpu.matmul %1, %2, %cst {dimension_numbers = #tpu.dot_dimension_numbers<[1], [0], [0], [1], [0, 0, 1, 1], [], []>} : vector<8x32xbf16>, vector<32x128xbf16>, vector<8x128xf32> -> vector<8x128xf32>
    %c0_3 = arith.constant 0 : index
    %c0_4 = arith.constant 0 : index
    %4 = vector.load %arg3[%c0_3, %c0_4] : memref<1x128xf32, #tpu.memory_space<vmem>>, vector<1x128xf32>
    %5 = vector.broadcast %4 : vector<1x128xf32> to vector<8x128xf32>
    %6 = arith.addf %3, %5 : vector<8x128xf32>
    %cst_5 = arith.constant 0.000000e+00 : f32
    %7 = vector.broadcast %cst_5 : f32 to vector<8x128xf32>
    %8 = arith.maximumf %6, %7 : vector<8x128xf32>
    %9 = arith.truncf %8 : vector<8x128xf32> to vector<8x128xbf16>
    %c0_6 = arith.constant 0 : index
    %c0_7 = arith.constant 0 : index
    %10 = vector.load %arg4[%c0_6, %c0_7] : memref<128x128xbf16, #tpu.memory_space<vmem>>, vector<128x128xbf16>
    %cst_8 = arith.constant dense<0.000000e+00> : vector<8x128xf32>
    %11 = tpu.matmul %9, %10, %cst_8 {dimension_numbers = #tpu.dot_dimension_numbers<[1], [0], [0], [1], [0, 0, 1, 1], [], []>} : vector<8x128xbf16>, vector<128x128xbf16>, vector<8x128xf32> -> vector<8x128xf32>
    %c0_9 = arith.constant 0 : index
    %c0_10 = arith.constant 0 : index
    %12 = vector.load %arg5[%c0_9, %c0_10] : memref<1x128xf32, #tpu.memory_space<vmem>>, vector<1x128xf32>
    %13 = vector.broadcast %12 : vector<1x128xf32> to vector<8x128xf32>
    %14 = arith.addf %11, %13 : vector<8x128xf32>
    %cst_11 = arith.constant 0.000000e+00 : f32
    %15 = vector.broadcast %cst_11 : f32 to vector<8x128xf32>
    %16 = arith.maximumf %14, %15 : vector<8x128xf32>
    %17 = arith.truncf %16 : vector<8x128xf32> to vector<8x128xbf16>
    %c0_12 = arith.constant 0 : index
    %c0_13 = arith.constant 0 : index
    %18 = vector.load %arg6[%c0_12, %c0_13] : memref<128x128xbf16, #tpu.memory_space<vmem>>, vector<128x128xbf16>
    %cst_14 = arith.constant dense<0.000000e+00> : vector<8x128xf32>
    %19 = tpu.matmul %17, %18, %cst_14 {dimension_numbers = #tpu.dot_dimension_numbers<[1], [0], [0], [1], [0, 0, 1, 1], [], []>} : vector<8x128xbf16>, vector<128x128xbf16>, vector<8x128xf32> -> vector<8x128xf32>
    %c0_15 = arith.constant 0 : index
    %c0_16 = arith.constant 0 : index
    %20 = vector.load %arg7[%c0_15, %c0_16] : memref<1x128xf32, #tpu.memory_space<vmem>>, vector<1x128xf32>
    %21 = vector.broadcast %20 : vector<1x128xf32> to vector<8x128xf32>
    %22 = arith.addf %19, %21 : vector<8x128xf32>
    %cst_17 = arith.constant dense<0.000000e+00> : vector<8xf32>
    %23 = vector.multi_reduction <add>, %22, %cst_17 [1] : vector<8x128xf32> to vector<8xf32>
    %24 = vector.shape_cast %23 : vector<8xf32> to vector<8x1xf32>
    %25 = arith.mulf %22, %22 : vector<8x128xf32>
    %cst_18 = arith.constant dense<0.000000e+00> : vector<8xf32>
    %26 = vector.multi_reduction <add>, %25, %cst_18 [1] : vector<8x128xf32> to vector<8xf32>
    %27 = vector.shape_cast %26 : vector<8xf32> to vector<8x1xf32>
    %cst_19 = arith.constant 7.812500e-03 : f32
    %28 = vector.broadcast %cst_19 : f32 to vector<8x1xf32>
    %29 = arith.mulf %24, %28 : vector<8x1xf32>
    %cst_20 = arith.constant 7.812500e-03 : f32
    %30 = vector.broadcast %cst_20 : f32 to vector<8x1xf32>
    %31 = arith.mulf %27, %30 : vector<8x1xf32>
    %32 = arith.mulf %29, %29 : vector<8x1xf32>
    %33 = arith.subf %31, %32 : vector<8x1xf32>
    %cst_21 = arith.constant 0.000000e+00 : f32
    %34 = vector.broadcast %cst_21 : f32 to vector<8x1xf32>
    %35 = arith.maximumf %33, %34 : vector<8x1xf32>
    %36 = vector.broadcast %29 : vector<8x1xf32> to vector<8x128xf32>
    %37 = arith.subf %22, %36 : vector<8x128xf32>
    %cst_22 = arith.constant 9.99999974E-6 : f32
    %38 = vector.broadcast %cst_22 : f32 to vector<8x1xf32>
    %39 = arith.addf %35, %38 : vector<8x1xf32>
    %40 = math.rsqrt %39 : vector<8x1xf32>
    %41 = vector.broadcast %40 : vector<8x1xf32> to vector<8x128xf32>
    %42 = arith.mulf %37, %41 : vector<8x128xf32>
    %c0_23 = arith.constant 0 : index
    %c0_24 = arith.constant 0 : index
    %43 = vector.load %arg8[%c0_23, %c0_24] : memref<1x128xf32, #tpu.memory_space<vmem>>, vector<1x128xf32>
    %44 = vector.broadcast %43 : vector<1x128xf32> to vector<8x128xf32>
    %45 = arith.mulf %42, %44 : vector<8x128xf32>
    %c0_25 = arith.constant 0 : index
    %c0_26 = arith.constant 0 : index
    %46 = vector.load %arg9[%c0_25, %c0_26] : memref<1x128xf32, #tpu.memory_space<vmem>>, vector<1x128xf32>
    %47 = vector.broadcast %46 : vector<1x128xf32> to vector<8x128xf32>
    %48 = arith.addf %45, %47 : vector<8x128xf32>
    %c0_27 = arith.constant 0 : index
    %c0_28 = arith.constant 0 : index
    %49 = vector.load %arg10[%c0_27, %c0_28] : memref<8x128xf32, #tpu.memory_space<vmem>>, vector<8x128xf32>
    tpu.vector_store %arg10[%c0_27, %c0_28], %48 {strides = array<i32>} : memref<8x128xf32, #tpu.memory_space<vmem>>, vector<8x128xf32>,
    return
  }
  func.func @transform_0(%arg0: i32) -> (i32, i32) {
    %c0_i32 = arith.constant 0 : i32
    %c0_i32_0 = arith.constant 0 : i32
    return %arg0, %c0_i32 : i32, i32
  }
  func.func @transform_1(%arg0: i32) -> (i32, i32) {
    %c0_i32 = arith.constant 0 : i32
    %c0_i32_0 = arith.constant 0 : i32
    %c0_i32_1 = arith.constant 0 : i32
    return %c0_i32, %c0_i32_0 : i32, i32
  }
  func.func @transform_2(%arg0: i32) -> (i32, i32) {
    %c0_i32 = arith.constant 0 : i32
    %c0_i32_0 = arith.constant 0 : i32
    %c0_i32_1 = arith.constant 0 : i32
    return %c0_i32, %c0_i32_0 : i32, i32
  }
  func.func @transform_3(%arg0: i32) -> (i32, i32) {
    %c0_i32 = arith.constant 0 : i32
    %c0_i32_0 = arith.constant 0 : i32
    %c0_i32_1 = arith.constant 0 : i32
    return %c0_i32, %c0_i32_0 : i32, i32
  }
  func.func @transform_4(%arg0: i32) -> (i32, i32) {
    %c0_i32 = arith.constant 0 : i32
    %c0_i32_0 = arith.constant 0 : i32
    %c0_i32_1 = arith.constant 0 : i32
    return %c0_i32, %c0_i32_0 : i32, i32
  }
  func.func @transform_5(%arg0: i32) -> (i32, i32) {
    %c0_i32 = arith.constant 0 : i32
    %c0_i32_0 = arith.constant 0 : i32
    %c0_i32_1 = arith.constant 0 : i32
    return %c0_i32, %c0_i32_0 : i32, i32
  }
  func.func @transform_6(%arg0: i32) -> (i32, i32) {
    %c0_i32 = arith.constant 0 : i32
    %c0_i32_0 = arith.constant 0 : i32
    %c0_i32_1 = arith.constant 0 : i32
    return %c0_i32, %c0_i32_0 : i32, i32
  }
  func.func @transform_7(%arg0: i32) -> (i32, i32) {
    %c0_i32 = arith.constant 0 : i32
    %c0_i32_0 = arith.constant 0 : i32
    %c0_i32_1 = arith.constant 0 : i32
    return %c0_i32, %c0_i32_0 : i32, i32
  }
  func.func @transform_8(%arg0: i32) -> (i32, i32) {
    %c0_i32 = arith.constant 0 : i32
    %c0_i32_0 = arith.constant 0 : i32
    %c0_i32_1 = arith.constant 0 : i32
    return %c0_i32, %c0_i32_0 : i32, i32
  }
  func.func @transform_9(%arg0: i32) -> (i32, i32) {
    %c0_i32 = arith.constant 0 : i32
    %c0_i32_0 = arith.constant 0 : i32
    return %arg0, %c0_i32 : i32, i32
  }
}

</mosaic_0001>

<bundles_post_ra>
// kernel: tpu_custom_call.1
= control target key start
LH: loop header
LB: loop body
LE: loop exit
PB: predicated region body
PF: predicated region fallthrough
CT: control target
= control target key end

     0   :  { %14 = vsyncpa [#allocation3], 0  ;;  %s673_s0 = inlined_call_operand.hbm [shape: f32[8,32], index: 0, kind: input, shape index: {}]   ;;  %s674_s1 = inlined_call_operand.hbm [shape: bf16[32,128], index: 1, kind: input, shape index: {}]   ;;  %s675_s2 = inlined_call_operand.vmem [shape: f32[1,128], index: 2, kind: input, shape index: {}]   ;;  %s676_s3 = inlined_call_operand.hbm [shape: bf16[128,128], index: 3, kind: input, shape index: {}]   ;;  %s677_s4 = inlined_call_operand.vmem [shape: f32[1,128], index: 4, kind: input, shape index: {}]   ;;  %s678_s5 = inlined_call_operand.hbm [shape: bf16[128,128], index: 5, kind: input, shape index: {}]   ;;  %s679_s6 = inlined_call_operand.vmem [shape: f32[1,128], index: 6, kind: input, shape index: {}]   ;;  %s680_s7 = inlined_call_operand.vmem [shape: f32[1,128], index: 7, kind: input, shape index: {}]   ;;  %s681_s8 = inlined_call_operand.vmem [shape: f32[1,128], index: 8, kind: input, shape index: {}]   ;;  %s682_s9 = inlined_call_operand.hbm [shape: f32[8,128], index: 9, kind: output, shape index: {}]  }
   0x1   :  { %15 = vsyncpa [#allocation6], 0 }
   0x2   :  { %16 = vsyncpa [#allocation9], 0  ;;  %s33_s11 = sshll.u32 %s674_s1, 4  ;;  %s34_s11 = int_to_ptr.hbm [resolvable:$true] %s33_s11 }
   0x3   :  { %17 = vsyncpa [#allocation4], 0  ;;  %s586_s12 = smov [#allocation5]   ;;  %s23_s16 = sshll.u32 %s673_s0, 4  ;;  %s24_s16 = int_to_ptr.hbm [resolvable:$true] %s23_s16 }
   0x4   :  { %s35_s13 = sshll.u32 %s586_s12, 4  ;;  %s587_s17 = smov 64   ;;  %s36_s13 = int_to_ptr.vmem [resolvable:$true] %s35_s13 }
   0x5   :  { %s588_s18 = smov 4   ;;  %s589_s19 = smov [#allocation2]  }
   0x6   :  { %41 = dma.hbm_to_vmem [thread:$0]  %s34_s11, 256, %s36_s13, [#allocation6], %s587_s17, %s587_s17, %s588_s18  }
   0x7   :  { %s25_s20 = sshll.u32 %s589_s19, 4  ;;  %s48_s23 = sshll.u32 %s676_s3, 4  ;;  %s26_s20 = int_to_ptr.vmem [resolvable:$true] %s25_s20  ;;  %s49_s23 = int_to_ptr.hbm [resolvable:$true] %s48_s23 }
   0x8   :  { %28 = dma.hbm_to_vmem [thread:$0]  %s24_s16, 128, %s26_s20, [#allocation3]  }
   0x9   :  { %s63_s25 = sshll.u32 %s678_s5, 4  ;;  %s590_s26 = smov [#allocation7]   ;;  %s64_s25 = int_to_ptr.hbm [resolvable:$true] %s63_s25 }
   0xa   :  { %s50_s27 = sshll.u32 %s590_s26, 4  ;;  %s591_s0 = smov [#allocation8]   ;;  %s51_s27 = int_to_ptr.vmem [resolvable:$true] %s50_s27 }
   0xb   :  { %56 = dma.hbm_to_vmem [thread:$0]  %s49_s23, 1024, %s51_s27, [#allocation6], %s587_s17, %s587_s17, %s588_s18  }
   0xc   :  { %s65_s28 = sshll.u32 %s591_s0, 4  ;;  %s66_s28 = int_to_ptr.vmem [resolvable:$true] %s65_s28 }
   0xd   :  { %71 = dma.hbm_to_vmem [thread:$0]  %s64_s25, 1024, %s66_s28, [#allocation9], %s587_s17, %s587_s17, %s588_s18  }
   0xe   :  { %578 = dma.done.wait [#allocation3], 128  }
   0xf   :  { %579 = vsyncadd [#allocation3], 4294967168 }
  0x10   :  { %580 = dma.done.wait [#allocation6], 1280  }
  0x11   :  { %581 = vsyncadd [#allocation6], 4294966016 }
  0x12   :  { %582 = dma.done.wait [#allocation9], 1024  }
  0x13   :  { %583 = vsyncadd [#allocation9], 4294966272  ;;  %v427_v0 = vld [vmem:[#allocation5 + $0x8] sm:$0xff]  ;;  %v426_v2 = vld [vmem:[#allocation5] sm:$0xff]  ;;  %vm117_vm0 = vcmask 261120   ;;  %s592_s13 = smov [#allocation10]  }
  0x14   :  { %v435_v1 = vld [vmem:[#allocation7 + $0x38] sm:$0xff]  ;;  %127 = vmatpush.bf16.msra.mxu0 %v427_v0  ;;  %v95_v3 = vld [vmem:[#allocation2] sm:$0xff]  ;;  %v434_v4 = vld [vmem:[#allocation7 + $0x30] sm:$0xff]  ;;  %s339_s14 = sshll.u32 %s592_s13, 4  ;;  %s341_s17 = sshll.u32 %s682_s9, 4  ;;  %s340_s14 = int_to_ptr.vmem [resolvable:$true] %s339_s14  ;;  %s342_s17 = int_to_ptr.hbm [resolvable:$true] %s341_s17 }
  0x15   :  { %204 = vmatpush.bf16.msra.mxu1 %v435_v1  ;;  %v96_v5 = vpack.c.bf16 %v95_v3, %v95_v3  ;;  %v433_v6 = vld [vmem:[#allocation7 + $0x28] sm:$0xff]  ;;  %v432_v7 = vld [vmem:[#allocation7 + $0x20] sm:$0xff]  ;;  %v431_v8 = vld [vmem:[#allocation7 + $0x18] sm:$0xff] }
  0x16   :  { %v430_v9 = vld [vmem:[#allocation7 + $0x10] sm:$0xff]  ;;  %v429_v10 = vld [vmem:[#allocation7 + $0x8] sm:$0xff]  ;;  %v428_v11 = vld [vmem:[#allocation7] sm:$0xff] }
  0x17   :  { %v443_v12 = vld [vmem:[#allocation8 + $0x38] sm:$0xff]  ;;  %v442_v13 = vld [vmem:[#allocation8 + $0x30] sm:$0xff]  ;;  %v441_v14 = vld [vmem:[#allocation8 + $0x28] sm:$0xff] }
  0x18   :  { %128 = vmatpush.bf16.msra.mxu0 %v426_v2  ;;  %287 = vmatpush.bf16.msra.mxu2 %v443_v12  ;;  %v440_v15 = vld [vmem:[#allocation8 + $0x20] sm:$0xff]  ;;  %v439_v16 = vld [vmem:[#allocation8 + $0x18] sm:$0xff]  ;;  %v438_v17 = vld [vmem:[#allocation8 + $0x10] sm:$0xff] }
  0x19   :  { %205 = vmatpush.bf16.msra.mxu1 %v434_v4  ;;  %v451_v18 = vld [vmem:[%s675_s2] ss:$0 sm:$0xff]  ;;  %v436_v25 = vld [vmem:[#allocation8] sm:$0xff] }
  0x1a   :  { %v437_v24 = vld [vmem:[#allocation8 + $0x8] sm:$0xff] }
  0x1b   :  { %361 = vmatmul.msk.bf16.vlgmr.msra.gmra.mxu0 %vm117_vm0, %v96_v5  ;;  %v452_v26 = vld [vmem:[%s677_s4] ss:$0 sm:$0xff] }
  0x1c   :  { %288 = vmatpush.bf16.msra.mxu2 %v442_v13  ;;  %v453_v32 = vld [vmem:[%s679_s6] ss:$0 sm:$0xff] }
  0x1d   :  { %206 = vmatpush.bf16.msra.mxu1 %v433_v6  ;;  %v454_v52 = vld [vmem:[%s680_s7] ss:$0 sm:$0xff] }
  0x1e   :  { %v455_v55 = vld [vmem:[%s681_s8] ss:$0 sm:$0xff] }
  0x20   :  { %289 = vmatpush.bf16.msra.mxu2 %v441_v14 }
  0x21   :  { %207 = vmatpush.bf16.msra.mxu1 %v432_v7 }
  0x24   :  { %290 = vmatpush.bf16.msra.mxu2 %v440_v15 }
  0x25   :  { %208 = vmatpush.bf16.msra.mxu1 %v431_v8 }
  0x28   :  { %291 = vmatpush.bf16.msra.mxu2 %v439_v16 }
  0x29   :  { %209 = vmatpush.bf16.msra.mxu1 %v430_v9 }
  0x2c   :  { %292 = vmatpush.bf16.msra.mxu2 %v438_v17 }
  0x2d   :  { %210 = vmatpush.bf16.msra.mxu1 %v429_v10 }
  0x30   :  { %293 = vmatpush.bf16.msra.mxu2 %v437_v24 }
  0x31   :  { %211 = vmatpush.bf16.msra.mxu1 %v428_v11 }
  0x34   :  { %294 = vmatpush.bf16.msra.mxu2 %v436_v25 }
  0x98   :  { %v130_v19 = vpop.f32.mrf.mxu0 }
  0x99   :  { %v131_v20 = vadd.f32 %v451_v18, %v130_v19 }
  0x9b   :  { %v134_v21 = vmax.f32 %v131_v20, 0.0 }
  0x9d   :  { %v135_v22 = vpack.c.bf16 %v134_v21, %v134_v21 }
  0x9f   :  { %212 = vmatmul.bf16.vlgmr.msra.gmra.mxu1 %v135_v22 }
  0xa0   :  { %v132_v23 = vpop.f32.mrf.mxu0 }
 0x11c   :  { %v213_v27 = vpop.f32.mrf.mxu1 }
 0x11d   :  { %v214_v28 = vadd.f32 %v452_v26, %v213_v27 }
 0x11f   :  { %v217_v29 = vmax.f32 %v214_v28, 0.0 }
 0x121   :  { %v218_v30 = vpack.c.bf16 %v217_v29, %v217_v29 }
 0x123   :  { %295 = vmatmul.bf16.vlgmr.msra.gmra.mxu2 %v218_v30 }
 0x124   :  { %v215_v31 = vpop.f32.mrf.mxu1 }
 0x1a6   :  { %v296_v33 = vpop.f32.mrf.mxu2 }
 0x1a7   :  { %v297_v34 = vadd.f32 %v453_v32, %v296_v33 }
 0x1a9   :  { %300 = vadd.xlane.f32.xlu0 %v297_v34  ;;  %v302_v36 = vmul.f32 %v297_v34, %v297_v34 }
 0x1ae   :  { %v298_v35 = vpop.f32.mrf.mxu2 }
 0x1b1   :  { %303 = vadd.xlane.f32.xlu0 %v302_v36 }
 0x21c   :  { %v301_v37 = vpop.xlane.xlu0 %300 }
 0x21d   :  { %v305_v38 = vmul.f32 0.0078125, %v301_v37 }
 0x21f   :  { %v307_v40 = vmul.f32 %v305_v38, %v305_v38  ;;  %v310_v51 = vsub.f32 %v297_v34, %v305_v38 }
 0x224   :  { %v304_v39 = vpop.xlane.xlu0 %303 }
 0x225   :  { %v306_v41 = vmul.f32 0.0078125, %v304_v39 }
 0x227   :  { %v308_v42 = vsub.f32 %v306_v41, %v307_v40 }
 0x229   :  { %v309_v43 = vmax.f32 %v308_v42, 0.0 }
 0x22b   :  { %v311_v44 = vadd.f32 1e-05, %v309_v43 }
 0x22d   :  { %456 = vrsqrt.f32 %v311_v44  ;;  %vm318_vm2 = vweird.f32 %v311_v44 }
 0x233   :  { %v457_v45 = vpop.eup %456 }
 0x234   :  { %v313_v46 = vmul.f32 %v457_v45, %v311_v44  ;;  %vm319_vm1 = vweird.f32 %v457_v45 }
 0x235   :  { %vm320_vm3 = vmor %vm318_vm2, %vm319_vm1 }
 0x236   :  { %v314_v47 = vmul.f32 %v457_v45, %v313_v46 }
 0x238   :  { %v315_v48 = vmul.f32 0.5, %v314_v47 }
 0x23a   :  { %v316_v49 = vsub.f32 1.5, %v315_v48 }
 0x23c   :  { %v317_v50 = vmul.f32 %v457_v45, %v316_v49 }
 0x23e   :  { %v321_v53 = vsel %vm320_vm3, %v457_v45, %v317_v50 }
 0x23f   :  { %v322_v54 = vmul.f32 %v321_v53, %v310_v51 }
 0x241   :  { %v327_v56 = vmul.f32 %v454_v52, %v322_v54 }
 0x243   :  { %v332_v57 = vadd.f32 %v455_v55, %v327_v56 }
 0x245   :  { %333 = vst [vmem:[#allocation10] sm:$0xff] %v332_v57 }
 0x246   :  { %344 = dma.vmem_to_hbm [thread:$0]  %s340_s14, 128, %s342_s17, [#allocation4]  }
 0x247   :  { %584 = dma.done.wait [#allocation4], 128  }
 0x248   :  { %585 = vsyncadd [#allocation4], 4294967168 }
 0x249   :  { %349 = vsyncpa [#allocation3], 1 }
 0x24a   :  { %350 = vsyncpa [#allocation6], 1 }
 0x24b   :  { %351 = vsyncpa [#allocation9], 1 }
 0x24c   :  { %352 = vsyncpa [#allocation4], 1 }

// kernel: tpu_custom_call.1
= control target key start
LH: loop header
LB: loop body
LE: loop exit
PB: predicated region body
PF: predicated region fallthrough
CT: control target
= control target key end

     0   :  { %14 = vsyncpa [#allocation3], 0  ;;  %s673_s0 = inlined_call_operand.hbm [shape: f32[8,32], index: 0, kind: input, shape index: {}]   ;;  %s674_s1 = inlined_call_operand.hbm [shape: bf16[32,128], index: 1, kind: input, shape index: {}]   ;;  %s675_s2 = inlined_call_operand.vmem [shape: f32[1,128], index: 2, kind: input, shape index: {}]   ;;  %s676_s3 = inlined_call_operand.hbm [shape: bf16[128,128], index: 3, kind: input, shape index: {}]   ;;  %s677_s4 = inlined_call_operand.vmem [shape: f32[1,128], index: 4, kind: input, shape index: {}]   ;;  %s678_s5 = inlined_call_operand.hbm [shape: bf16[128,128], index: 5, kind: input, shape index: {}]   ;;  %s679_s6 = inlined_call_operand.vmem [shape: f32[1,128], index: 6, kind: input, shape index: {}]   ;;  %s680_s7 = inlined_call_operand.vmem [shape: f32[1,128], index: 7, kind: input, shape index: {}]   ;;  %s681_s8 = inlined_call_operand.vmem [shape: f32[1,128], index: 8, kind: input, shape index: {}]   ;;  %s682_s9 = inlined_call_operand.hbm [shape: f32[8,128], index: 9, kind: output, shape index: {}]  }
   0x1   :  { %15 = vsyncpa [#allocation6], 0 }
   0x2   :  { %16 = vsyncpa [#allocation9], 0  ;;  %s33_s11 = sshll.u32 %s674_s1, 4  ;;  %s34_s11 = int_to_ptr.hbm [resolvable:$true] %s33_s11 }
   0x3   :  { %17 = vsyncpa [#allocation4], 0  ;;  %s586_s12 = smov [#allocation5]   ;;  %s23_s16 = sshll.u32 %s673_s0, 4  ;;  %s24_s16 = int_to_ptr.hbm [resolvable:$true] %s23_s16 }
   0x4   :  { %s35_s13 = sshll.u32 %s586_s12, 4  ;;  %s587_s17 = smov 64   ;;  %s36_s13 = int_to_ptr.vmem [resolvable:$true] %s35_s13 }
   0x5   :  { %s588_s18 = smov 4   ;;  %s589_s19 = smov [#allocation2]  }
   0x6   :  { %41 = dma.hbm_to_vmem [thread:$0]  %s34_s11, 256, %s36_s13, [#allocation6], %s587_s17, %s587_s17, %s588_s18  }
   0x7   :  { %s25_s20 = sshll.u32 %s589_s19, 4  ;;  %s48_s23 = sshll.u32 %s676_s3, 4  ;;  %s26_s20 = int_to_ptr.vmem [resolvable:$true] %s25_s20  ;;  %s49_s23 = int_to_ptr.hbm [resolvable:$true] %s48_s23 }
   0x8   :  { %28 = dma.hbm_to_vmem [thread:$0]  %s24_s16, 128, %s26_s20, [#allocation3]  }
   0x9   :  { %s63_s25 = sshll.u32 %s678_s5, 4  ;;  %s590_s26 = smov [#allocation7]   ;;  %s64_s25 = int_to_ptr.hbm [resolvable:$true] %s63_s25 }
   0xa   :  { %s50_s27 = sshll.u32 %s590_s26, 4  ;;  %s591_s0 = smov [#allocation8]   ;;  %s51_s27 = int_to_ptr.vmem [resolvable:$true] %s50_s27 }
   0xb   :  { %56 = dma.hbm_to_vmem [thread:$0]  %s49_s23, 1024, %s51_s27, [#allocation6], %s587_s17, %s587_s17, %s588_s18  }
   0xc   :  { %s65_s28 = sshll.u32 %s591_s0, 4  ;;  %s66_s28 = int_to_ptr.vmem [resolvable:$true] %s65_s28 }
   0xd   :  { %71 = dma.hbm_to_vmem [thread:$0]  %s64_s25, 1024, %s66_s28, [#allocation9], %s587_s17, %s587_s17, %s588_s18  }
   0xe   :  { %578 = dma.done.wait [#allocation3], 128  }
   0xf   :  { %579 = vsyncadd [#allocation3], 4294967168 }
  0x10   :  { %580 = dma.done.wait [#allocation6], 1280  }
  0x11   :  { %581 = vsyncadd [#allocation6], 4294966016 }
  0x12   :  { %582 = dma.done.wait [#allocation9], 1024  }
  0x13   :  { %583 = vsyncadd [#allocation9], 4294966272  ;;  %v427_v0 = vld [vmem:[#allocation5 + $0x8] sm:$0xff]  ;;  %v426_v2 = vld [vmem:[#allocation5] sm:$0xff]  ;;  %vm117_vm0 = vcmask 261120   ;;  %s592_s13 = smov [#allocation10]  }
  0x14   :  { %v435_v1 = vld [vmem:[#allocation7 + $0x38] sm:$0xff]  ;;  %127 = vmatpush.bf16.msra.mxu0 %v427_v0  ;;  %v95_v3 = vld [vmem:[#allocation2] sm:$0xff]  ;;  %v434_v4 = vld [vmem:[#allocation7 + $0x30] sm:$0xff]  ;;  %s339_s14 = sshll.u32 %s592_s13, 4  ;;  %s341_s17 = sshll.u32 %s682_s9, 4  ;;  %s340_s14 = int_to_ptr.vmem [resolvable:$true] %s339_s14  ;;  %s342_s17 = int_to_ptr.hbm [resolvable:$true] %s341_s17 }
  0x15   :  { %204 = vmatpush.bf16.msra.mxu1 %v435_v1  ;;  %v96_v5 = vpack.c.bf16 %v95_v3, %v95_v3  ;;  %v433_v6 = vld [vmem:[#allocation7 + $0x28] sm:$0xff]  ;;  %v432_v7 = vld [vmem:[#allocation7 + $0x20] sm:$0xff]  ;;  %v431_v8 = vld [vmem:[#allocation7 + $0x18] sm:$0xff] }
  0x16   :  { %v430_v9 = vld [vmem:[#allocation7 + $0x10] sm:$0xff]  ;;  %v429_v10 = vld [vmem:[#allocation7 + $0x8] sm:$0xff]  ;;  %v428_v11 = vld [vmem:[#allocation7] sm:$0xff] }
  0x17   :  { %v443_v12 = vld [vmem:[#allocation8 + $0x38] sm:$0xff]  ;;  %v442_v13 = vld [vmem:[#allocation8 + $0x30] sm:$0xff]  ;;  %v441_v14 = vld [vmem:[#allocation8 + $0x28] sm:$0xff] }
  0x18   :  { %128 = vmatpush.bf16.msra.mxu0 %v426_v2  ;;  %287 = vmatpush.bf16.msra.mxu2 %v443_v12  ;;  %v440_v15 = vld [vmem:[#allocation8 + $0x20] sm:$0xff]  ;;  %v439_v16 = vld [vmem:[#allocation8 + $0x18] sm:$0xff]  ;;  %v438_v17 = vld [vmem:[#allocation8 + $0x10] sm:$0xff] }
  0x19   :  { %205 = vmatpush.bf16.msra.mxu1 %v434_v4  ;;  %v451_v18 = vld [vmem:[%s675_s2] ss:$0 sm:$0xff]  ;;  %v436_v25 = vld [vmem:[#allocation8] sm:$0xff] }
  0x1a   :  { %v437_v24 = vld [vmem:[#allocation8 + $0x8] sm:$0xff] }
  0x1b   :  { %361 = vmatmul.msk.bf16.vlgmr.msra.gmra.mxu0 %vm117_vm0, %v96_v5  ;;  %v452_v26 = vld [vmem:[%s677_s4] ss:$0 sm:$0xff] }
  0x1c   :  { %288 = vmatpush.bf16.msra.mxu2 %v442_v13  ;;  %v453_v32 = vld [vmem:[%s679_s6] ss:$0 sm:$0xff] }
  0x1d   :  { %206 = vmatpush.bf16.msra.mxu1 %v433_v6  ;;  %v454_v52 = vld [vmem:[%s680_s7] ss:$0 sm:$0xff] }
  0x1e   :  { %v455_v55 = vld [vmem:[%s681_s8] ss:$0 sm:$0xff] }
  0x20   :  { %289 = vmatpush.bf16.msra.mxu2 %v441_v14 }
  0x21   :  { %207 = vmatpush.bf16.msra.mxu1 %v432_v7 }
  0x24   :  { %290 = vmatpush.bf16.msra.mxu2 %v440_v15 }
  0x25   :  { %208 = vmatpush.bf16.msra.mxu1 %v431_v8 }
  0x28   :  { %291 = vmatpush.bf16.msra.mxu2 %v439_v16 }
  0x29   :  { %209 = vmatpush.bf16.msra.mxu1 %v430_v9 }
  0x2c   :  { %292 = vmatpush.bf16.msra.mxu2 %v438_v17 }
  0x2d   :  { %210 = vmatpush.bf16.msra.mxu1 %v429_v10 }
  0x30   :  { %293 = vmatpush.bf16.msra.mxu2 %v437_v24 }
  0x31   :  { %211 = vmatpush.bf16.msra.mxu1 %v428_v11 }
  0x34   :  { %294 = vmatpush.bf16.msra.mxu2 %v436_v25 }
  0x98   :  { %v130_v19 = vpop.f32.mrf.mxu0 }
  0x99   :  { %v131_v20 = vadd.f32 %v451_v18, %v130_v19 }
  0x9b   :  { %v134_v21 = vmax.f32 %v131_v20, 0.0 }
  0x9d   :  { %v135_v22 = vpack.c.bf16 %v134_v21, %v134_v21 }
  0x9f   :  { %212 = vmatmul.bf16.vlgmr.msra.gmra.mxu1 %v135_v22 }
  0xa0   :  { %v132_v23 = vpop.f32.mrf.mxu0 }
 0x11c   :  { %v213_v27 = vpop.f32.mrf.mxu1 }
 0x11d   :  { %v214_v28 = vadd.f32 %v452_v26, %v213_v27 }
 0x11f   :  { %v217_v29 = vmax.f32 %v214_v28, 0.0 }
 0x121   :  { %v218_v30 = vpack.c.bf16 %v217_v29, %v217_v29 }
 0x123   :  { %295 = vmatmul.bf16.vlgmr.msra.gmra.mxu2 %v218_v30 }
 0x124   :  { %v215_v31 = vpop.f32.mrf.mxu1 }
 0x1a6   :  { %v296_v33 = vpop.f32.mrf.mxu2 }
 0x1a7   :  { %v297_v34 = vadd.f32 %v453_v32, %v296_v33 }
 0x1a9   :  { %300 = vadd.xlane.f32.xlu0 %v297_v34  ;;  %v302_v36 = vmul.f32 %v297_v34, %v297_v34 }
 0x1ae   :  { %v298_v35 = vpop.f32.mrf.mxu2 }
 0x1b1   :  { %303 = vadd.xlane.f32.xlu0 %v302_v36 }
 0x21c   :  { %v301_v37 = vpop.xlane.xlu0 %300 }
 0x21d   :  { %v305_v38 = vmul.f32 0.0078125, %v301_v37 }
 0x21f   :  { %v307_v40 = vmul.f32 %v305_v38, %v305_v38  ;;  %v310_v51 = vsub.f32 %v297_v34, %v305_v38 }
 0x224   :  { %v304_v39 = vpop.xlane.xlu0 %303 }
 0x225   :  { %v306_v41 = vmul.f32 0.0078125, %v304_v39 }
 0x227   :  { %v308_v42 = vsub.f32 %v306_v41, %v307_v40 }
 0x229   :  { %v309_v43 = vmax.f32 %v308_v42, 0.0 }
 0x22b   :  { %v311_v44 = vadd.f32 1e-05, %v309_v43 }
 0x22d   :  { %456 = vrsqrt.f32 %v311_v44  ;;  %vm318_vm2 = vweird.f32 %v311_v44 }
 0x233   :  { %v457_v45 = vpop.eup %456 }
 0x234   :  { %v313_v46 = vmul.f32 %v457_v45, %v311_v44  ;;  %vm319_vm1 = vweird.f32 %v457_v45 }
 0x235   :  { %vm320_vm3 = vmor %vm318_vm2, %vm319_vm1 }
 0x236   :  { %v314_v47 = vmul.f32 %v457_v45, %v313_v46 }
 0x238   :  { %v315_v48 = vmul.f32 0.5, %v314_v47 }
 0x23a   :  { %v316_v49 = vsub.f32 1.5, %v315_v48 }
 0x23c   :  { %v317_v50 = vmul.f32 %v457_v45, %v316_v49 }
 0x23e   :  { %v321_v53 = vsel %vm320_vm3, %v457_v45, %v317_v50 }
 0x23f   :  { %v322_v54 = vmul.f32 %v321_v53, %v310_v51 }
 0x241   :  { %v327_v56 = vmul.f32 %v454_v52, %v322_v54 }
 0x243   :  { %v332_v57 = vadd.f32 %v455_v55, %v327_v56 }
 0x245   :  { %333 = vst [vmem:[#allocation10] sm:$0xff] %v332_v57 }
 0x246   :  { %344 = dma.vmem_to_hbm [thread:$0]  %s340_s14, 128, %s342_s17, [#allocation4]  }
 0x247   :  { %584 = dma.done.wait [#allocation4], 128  }
 0x248   :  { %585 = vsyncadd [#allocation4], 4294967168 }
 0x249   :  { %349 = vsyncpa [#allocation3], 1 }
 0x24a   :  { %350 = vsyncpa [#allocation6], 1 }
 0x24b   :  { %351 = vsyncpa [#allocation9], 1 }
 0x24c   :  { %352 = vsyncpa [#allocation4], 1 }

</bundles_post_ra>
